<compile_context>
chip_gen: v6e
topology: v6e:2x2x1
jax: 0.10.0
libtpu: 0.0.40
codegen_flags: <defaults>
</compile_context>

<pallas_src>
import functools

import jax
import jax.numpy as jnp
import numpy as np
from jax.experimental import pallas as pl
from jax.experimental.pallas import tpu as pltpu

BN_EPS = 1e-5
L2_EPS = 1e-12


def _speaker_encoder_kernel(hs_ref, mask_ref, w1_ref, b1_ref, w2_ref, b2_ref,
                            out_ref, acc_sum, acc_cnt,
                            *, t_tile, t_total, mask_edge):
    """Grid: (batch tiles [parallel], time tiles [arbitrary reduction])."""
    t = pl.program_id(1)

    # ---- init accumulators at the start of each batch tile's T loop ----
    @pl.when(t == 0)
    def _init():
        acc_sum[...] = jnp.zeros_like(acc_sum)
        acc_cnt[...] = jnp.zeros_like(acc_cnt)

    hs = hs_ref[...]                               # [b_tile, t_tile, H]
    m = mask_ref[...]                              # [b_tile, t_tile]
    if mask_edge:
        # Last time tile overhangs T: OOB block contents are undefined, so
        # zero them before they can reach the accumulators.
        tpos = t * t_tile + jax.lax.broadcasted_iota(jnp.int32, (1, t_tile), 1)
        valid = tpos < t_total                     # [1, t_tile]
        hs = jnp.where(valid[:, :, None], hs, 0)
        m = jnp.where(valid, m, 0)

    # ---- masked sum over this time tile (native-dtype stream, f32 acc) ----
    hs = hs.astype(jnp.float32)
    m = m.astype(jnp.float32)
    acc_sum[...] += jnp.sum(hs * m[:, :, None], axis=1)          # [b_tile, H]
    acc_cnt[...] += jnp.sum(m, axis=1, keepdims=True)            # [b_tile, 1]

    # ---- head epilogue on the last time tile ----
    @pl.when(t == pl.num_programs(1) - 1)
    def _head():
        # clamp guards against an all-zero attention mask (NaN insurance).
        pooled = acc_sum[...] / jnp.maximum(acc_cnt[...], 1.0)   # [b_tile, H]

        # Linear(H,512) with eval-mode BatchNorm1d folded into w1/b1.
        h1 = jnp.dot(pooled, w1_ref[...],
                     preferred_element_type=jnp.float32) + b1_ref[...]
        h1 = jnp.maximum(h1, 0.0)                                # ReLU

        # Linear(512, embedding_dim)
        emb = jnp.dot(h1, w2_ref[...],
                      preferred_element_type=jnp.float32) + b2_ref[...]

        # F.normalize(p=2, dim=1) via rsqrt (EUP) instead of sqrt + divide.
        sq = jnp.sum(emb * emb, axis=1, keepdims=True)
        out_ref[...] = emb * jax.lax.rsqrt(jnp.maximum(sq, L2_EPS * L2_EPS))


def speaker_encoder_forward(hidden_states, attention_mask, params,
                            *, t_tile_max=512, vmem_buffer_budget=8 << 20):
    """hidden_states: [B, T, H]; attention_mask: [B, T] or None."""
    B, T, H = hidden_states.shape
    P = params["w1"].shape[1]          # projector hidden (512)
    E = params["w2"].shape[1]          # embedding dim (256)

    # ---- fold eval-mode BatchNorm1d into the first Linear (host, f32) ----
    scale = params["gamma"] / jnp.sqrt(params["rvar"] + BN_EPS)       # [1, P]
    w1 = (params["w1"] * scale).astype(jnp.float32)                   # [H, P]
    b1 = ((params["b1"] - params["rmean"]) * scale
          + params["beta"]).astype(jnp.float32)                       # [1, P]
    w2 = params["w2"].astype(jnp.float32)
    b2 = params["b2"].astype(jnp.float32)

    if attention_mask is None:
        attention_mask = jnp.ones((B, T), jnp.float32)
    mask = attention_mask.astype(jnp.float32)

    # ---- tile plan ----
    # batch tile: 8-aligned when possible, otherwise the full batch.
    b_tile = 8 if (B % 8 == 0) else B
    nb = B // b_tile

    # time tile: full T if it fits, else a 128-aligned tile bounded by a
    # per-pipeline-buffer VMEM budget (double-buffered stream stays in VMEM).
    itemsize = jnp.dtype(hidden_states.dtype).itemsize
    bytes_per_frame = b_tile * H * itemsize
    t_budget = max(128, (vmem_buffer_budget // bytes_per_frame) // 128 * 128)
    t_tile = max(128, (min(t_tile_max, t_budget) // 128) * 128)
    if T <= t_tile:
        t_tile = T
    nt = pl.cdiv(T, t_tile)
    mask_edge = (T % t_tile) != 0      # ragged edge handled in-kernel

    kernel = functools.partial(_speaker_encoder_kernel,
                               t_tile=t_tile, t_total=T, mask_edge=mask_edge)

    grid_spec = pltpu.PrefetchScalarGridSpec(
        num_scalar_prefetch=0,
        grid=(nb, nt),
        in_specs=[
            pl.BlockSpec((b_tile, t_tile, H), lambda b, t: (b, t, 0)),  # hs
            pl.BlockSpec((b_tile, t_tile), lambda b, t: (b, t)),        # mask
            pl.BlockSpec((H, P), lambda b, t: (0, 0)),                  # w1
            pl.BlockSpec((1, P), lambda b, t: (0, 0)),                  # b1
            pl.BlockSpec((P, E), lambda b, t: (0, 0)),                  # w2
            pl.BlockSpec((1, E), lambda b, t: (0, 0)),                  # b2
        ],
        out_specs=pl.BlockSpec((b_tile, E), lambda b, t: (b, 0)),
        scratch_shapes=[
            pltpu.VMEM((b_tile, H), jnp.float32),   # masked-sum accumulator
            pltpu.VMEM((b_tile, 1), jnp.float32),   # mask-count accumulator
        ],
    )

    return pl.pallas_call(
        kernel,
        out_shape=jax.ShapeDtypeStruct((B, E), jnp.float32),
        grid_spec=grid_spec,
        compiler_params=pltpu.CompilerParams(
            dimension_semantics=("parallel", "arbitrary"),
            vmem_limit_bytes=32 * 1024 * 1024,
        ),
    )(hidden_states, mask, w1, b1, w2, b2)


def init_params(key, hidden_size=32, proj_hidden=512, embedding_dim=256):
    ks = jax.random.split(key, 6)
    s1 = 1.0 / np.sqrt(hidden_size)
    s2 = 1.0 / np.sqrt(proj_hidden)
    return {
        # Linear(hidden_size, 512)
        "w1": jax.random.uniform(ks[0], (hidden_size, proj_hidden),
                                 jnp.float32, -s1, s1),
        "b1": jax.random.uniform(ks[1], (1, proj_hidden), jnp.float32, -s1, s1),
        # BatchNorm1d(512): affine params + deterministic running stats
        "gamma": jnp.ones((1, proj_hidden), jnp.float32),
        "beta": jnp.zeros((1, proj_hidden), jnp.float32),
        "rmean": 0.01 * jax.random.normal(ks[2], (1, proj_hidden), jnp.float32),
        "rvar": jnp.ones((1, proj_hidden), jnp.float32)
                + 0.01 * jax.random.uniform(ks[3], (1, proj_hidden), jnp.float32),
        # Linear(512, embedding_dim)
        "w2": jax.random.uniform(ks[4], (proj_hidden, embedding_dim),
                                 jnp.float32, -s2, s2),
        "b2": jax.random.uniform(ks[5], (1, embedding_dim), jnp.float32, -s2, s2),
    }


def reference_forward(hidden_states, attention_mask, params):
    """Plain-JAX reference (BatchNorm NOT folded -> also checks the fold)."""
    hs = hidden_states.astype(jnp.float32)
    m = attention_mask.astype(jnp.float32)[:, :, None]
    pooled = jnp.sum(hs * m, axis=1) / jnp.maximum(jnp.sum(m, axis=1), 1.0)
    h1 = pooled @ params["w1"] + params["b1"]
    h1 = (h1 - params["rmean"]) / jnp.sqrt(params["rvar"] + BN_EPS) \
         * params["gamma"] + params["beta"]
    h1 = jnp.maximum(h1, 0.0)
    emb = h1 @ params["w2"] + params["b2"]
    norm = jnp.sqrt(jnp.sum(emb * emb, axis=1, keepdims=True))
    return emb / jnp.maximum(norm, L2_EPS)


def _check(B, T, H, lengths, key, *, mask_is_none=False, **fwd_kwargs):
    k_hs, k_p = jax.random.split(key)
    # hidden_states as bf16 (backbone output dtype): kernel streams the native
    # dtype, and the reference sees the same quantized values.
    hs = jax.random.normal(k_hs, (B, T, H), jnp.float32).astype(jnp.bfloat16)
    attn = (jnp.arange(T)[None, :] < jnp.asarray(lengths)[:, None]
            ).astype(jnp.float32)
    params = init_params(k_p, hidden_size=H)

    out = speaker_encoder_forward(hs, None if mask_is_none else attn,
                                  params, **fwd_kwargs)
    out = jax.block_until_ready(out)
    ref_mask = jnp.ones((B, T), jnp.float32) if mask_is_none else attn
    ref = reference_forward(hs, ref_mask, params)
    # tolerance covers MXU f32 precision-mode / rsqrt differences between
    # Mosaic and XLA; structural bugs would be orders of magnitude larger.
    np.testing.assert_allclose(np.asarray(out), np.asarray(ref),
                               rtol=1e-4, atol=1e-4)


if __name__ == "__main__":
    key = jax.random.PRNGKey(0)
    k1, k2, k3 = jax.random.split(key, 3)

    # small smoke test (single tile): B=2, T=8, H=32
    _check(B=2, T=8, H=32, lengths=[8, 4], key=k1)

    # tiled path with ragged edge: T=300, t_tile=128 -> 3 time tiles, last one
    # overhangs by 84 frames (masked in-kernel), 8-aligned batch tile.
    _check(B=8, T=300, H=32,
           lengths=[300, 250, 200, 150, 100, 64, 17, 5],
           key=k2, t_tile_max=128)

    # attention_mask=None path (plain mean pooling).
    _check(B=2, T=8, H=32, lengths=[8, 8], key=k3, mask_is_none=True)

    print("KERNEL_OK")
</pallas_src>

<mosaic_0001>
module attributes {stable_mosaic.version = 11 : i64} {
  func.func @_speaker_encoder_kernel(%arg0: i32, %arg1: i32, %arg2: memref<2x8x32xbf16, #tpu.memory_space<vmem>>, %arg3: memref<2x8xf32, #tpu.memory_space<vmem>>, %arg4: memref<32x512xf32, #tpu.memory_space<vmem>>, %arg5: memref<1x512xf32, #tpu.memory_space<vmem>>, %arg6: memref<512x256xf32, #tpu.memory_space<vmem>>, %arg7: memref<1x256xf32, #tpu.memory_space<vmem>>, %arg8: memref<2x256xf32, #tpu.memory_space<vmem>>, %arg9: memref<2x32xf32, #tpu.memory_space<vmem>>, %arg10: memref<2x1xf32, #tpu.memory_space<vmem>>) attributes {dimension_semantics = [#tpu.dimension_semantics<parallel>, #tpu.dimension_semantics<arbitrary>], iteration_bounds = array<i64: 1, 1>, scalar_prefetch = 0 : i64, scratch_operands = 2 : i64, tpu.core_type = #tpu.core_type<tc>, window_params = [{transform_indices = @transform_0, window_bounds = array<i64: 2, 8, 32>}, {transform_indices = @transform_1, window_bounds = array<i64: 2, 8>}, {pipeline_mode = #tpu.pipeline_mode<synchronous>, transform_indices = @transform_2, window_bounds = array<i64: 32, 512>}, {pipeline_mode = #tpu.pipeline_mode<synchronous>, transform_indices = @transform_3, window_bounds = array<i64: 1, 512>}, {pipeline_mode = #tpu.pipeline_mode<synchronous>, transform_indices = @transform_4, window_bounds = array<i64: 512, 256>}, {pipeline_mode = #tpu.pipeline_mode<synchronous>, transform_indices = @transform_5, window_bounds = array<i64: 1, 256>}, {transform_indices = @transform_6, window_bounds = array<i64: 2, 256>}]} {
    %c0_i32 = arith.constant 0 : i32
    %0 = arith.cmpi eq, %arg1, %c0_i32 : i32
    %1 = arith.extui %0 : i1 to i32
    %c0_i32_0 = arith.constant 0 : i32
    %2 = arith.cmpi ne, %1, %c0_i32_0 : i32
    scf.if %2 {
      %cst_16 = arith.constant 0.000000e+00 : f32
      %21 = vector.broadcast %cst_16 : f32 to vector<2x32xf32>
      %c0_17 = arith.constant 0 : index
      %c0_18 = arith.constant 0 : index
      %22 = vector.load %arg9[%c0_17, %c0_18] : memref<2x32xf32, #tpu.memory_space<vmem>>, vector<2x32xf32>
      tpu.vector_store %arg9[%c0_17, %c0_18], %21 {strides = array<i32>} : memref<2x32xf32, #tpu.memory_space<vmem>>, vector<2x32xf32>,
      %cst_19 = arith.constant 0.000000e+00 : f32
      %23 = vector.broadcast %cst_19 : f32 to vector<2x1xf32>
      %c0_20 = arith.constant 0 : index
      %c0_21 = arith.constant 0 : index
      %24 = vector.load %arg10[%c0_20, %c0_21] : memref<2x1xf32, #tpu.memory_space<vmem>>, vector<2x1xf32>
      tpu.vector_store %arg10[%c0_20, %c0_21], %23 {strides = array<i32>} : memref<2x1xf32, #tpu.memory_space<vmem>>, vector<2x1xf32>,
    } else {
    }
    %c0 = arith.constant 0 : index
    %c0_1 = arith.constant 0 : index
    %c0_2 = arith.constant 0 : index
    %3 = vector.load %arg2[%c0, %c0_1, %c0_2] : memref<2x8x32xbf16, #tpu.memory_space<vmem>>, vector<2x8x32xbf16>
    %c0_3 = arith.constant 0 : index
    %c0_4 = arith.constant 0 : index
    %4 = vector.load %arg3[%c0_3, %c0_4] : memref<2x8xf32, #tpu.memory_space<vmem>>, vector<2x8xf32>
    %5 = arith.extf %3 : vector<2x8x32xbf16> to vector<2x8x32xf32>
    %c0_5 = arith.constant 0 : index
    %c0_6 = arith.constant 0 : index
    %6 = vector.load %arg9[%c0_5, %c0_6] : memref<2x32xf32, #tpu.memory_space<vmem>>, vector<2x32xf32>
    %7 = vector.shape_cast %4 : vector<2x8xf32> to vector<2x8x1xf32>
    %8 = vector.broadcast %7 : vector<2x8x1xf32> to vector<2x8x32xf32>
    %9 = arith.mulf %5, %8 : vector<2x8x32xf32>
    %cst = arith.constant dense<0.000000e+00> : vector<2x32xf32>
    %10 = vector.multi_reduction <add>, %9, %cst [1] : vector<2x8x32xf32> to vector<2x32xf32>
    %11 = arith.addf %6, %10 : vector<2x32xf32>
    %c0_7 = arith.constant 0 : index
    %c0_8 = arith.constant 0 : index
    %12 = vector.load %arg9[%c0_7, %c0_8] : memref<2x32xf32, #tpu.memory_space<vmem>>, vector<2x32xf32>
    tpu.vector_store %arg9[%c0_7, %c0_8], %11 {strides = array<i32>} : memref<2x32xf32, #tpu.memory_space<vmem>>, vector<2x32xf32>,
    %c0_9 = arith.constant 0 : index
    %c0_10 = arith.constant 0 : index
    %13 = vector.load %arg10[%c0_9, %c0_10] : memref<2x1xf32, #tpu.memory_space<vmem>>, vector<2x1xf32>
    %cst_11 = arith.constant dense<0.000000e+00> : vector<2xf32>
    %14 = vector.multi_reduction <add>, %4, %cst_11 [1] : vector<2x8xf32> to vector<2xf32>
    %15 = vector.shape_cast %14 : vector<2xf32> to vector<2x1xf32>
    %16 = arith.addf %13, %15 : vector<2x1xf32>
    %c0_12 = arith.constant 0 : index
    %c0_13 = arith.constant 0 : index
    %17 = vector.load %arg10[%c0_12, %c0_13] : memref<2x1xf32, #tpu.memory_space<vmem>>, vector<2x1xf32>
    tpu.vector_store %arg10[%c0_12, %c0_13], %16 {strides = array<i32>} : memref<2x1xf32, #tpu.memory_space<vmem>>, vector<2x1xf32>,
    %c0_i32_14 = arith.constant 0 : i32
    %18 = arith.cmpi eq, %arg1, %c0_i32_14 : i32
    %19 = arith.extui %18 : i1 to i32
    %c0_i32_15 = arith.constant 0 : i32
    %20 = arith.cmpi ne, %19, %c0_i32_15 : i32
    scf.if %20 {
      %c0_16 = arith.constant 0 : index
      %c0_17 = arith.constant 0 : index
      %21 = vector.load %arg9[%c0_16, %c0_17] : memref<2x32xf32, #tpu.memory_space<vmem>>, vector<2x32xf32>
      %c0_18 = arith.constant 0 : index
      %c0_19 = arith.constant 0 : index
      %22 = vector.load %arg10[%c0_18, %c0_19] : memref<2x1xf32, #tpu.memory_space<vmem>>, vector<2x1xf32>
      %cst_20 = arith.constant 1.000000e+00 : f32
      %23 = vector.broadcast %cst_20 : f32 to vector<2x1xf32>
      %24 = arith.maximumf %22, %23 : vector<2x1xf32>
      %25 = vector.broadcast %24 : vector<2x1xf32> to vector<2x32xf32>
      %26 = arith.divf %21, %25 : vector<2x32xf32>
      %c0_21 = arith.constant 0 : index
      %c0_22 = arith.constant 0 : index
      %27 = vector.load %arg4[%c0_21, %c0_22] : memref<32x512xf32, #tpu.memory_space<vmem>>, vector<32x512xf32>
      %cst_23 = arith.constant dense<0.000000e+00> : vector<2x512xf32>
      %28 = tpu.matmul %26, %27, %cst_23 {dimension_numbers = #tpu.dot_dimension_numbers<[1], [0], [0], [1], [0, 0, 1, 1], [], []>} : vector<2x32xf32>, vector<32x512xf32>, vector<2x512xf32> -> vector<2x512xf32>
      %c0_24 = arith.constant 0 : index
      %c0_25 = arith.constant 0 : index
      %29 = vector.load %arg5[%c0_24, %c0_25] : memref<1x512xf32, #tpu.memory_space<vmem>>, vector<1x512xf32>
      %30 = vector.broadcast %29 : vector<1x512xf32> to vector<2x512xf32>
      %31 = arith.addf %28, %30 : vector<2x512xf32>
      %cst_26 = arith.constant 0.000000e+00 : f32
      %32 = vector.broadcast %cst_26 : f32 to vector<2x512xf32>
      %33 = arith.maximumf %31, %32 : vector<2x512xf32>
      %c0_27 = arith.constant 0 : index
      %c0_28 = arith.constant 0 : index
      %34 = vector.load %arg6[%c0_27, %c0_28] : memref<512x256xf32, #tpu.memory_space<vmem>>, vector<512x256xf32>
      %cst_29 = arith.constant dense<0.000000e+00> : vector<2x256xf32>
      %35 = tpu.matmul %33, %34, %cst_29 {dimension_numbers = #tpu.dot_dimension_numbers<[1], [0], [0], [1], [0, 0, 1, 1], [], []>} : vector<2x512xf32>, vector<512x256xf32>, vector<2x256xf32> -> vector<2x256xf32>
      %c0_30 = arith.constant 0 : index
      %c0_31 = arith.constant 0 : index
      %36 = vector.load %arg7[%c0_30, %c0_31] : memref<1x256xf32, #tpu.memory_space<vmem>>, vector<1x256xf32>
      %37 = vector.broadcast %36 : vector<1x256xf32> to vector<2x256xf32>
      %38 = arith.addf %35, %37 : vector<2x256xf32>
      %39 = arith.mulf %38, %38 : vector<2x256xf32>
      %cst_32 = arith.constant dense<0.000000e+00> : vector<2xf32>
      %40 = vector.multi_reduction <add>, %39, %cst_32 [1] : vector<2x256xf32> to vector<2xf32>
      %41 = vector.shape_cast %40 : vector<2xf32> to vector<2x1xf32>
      %cst_33 = arith.constant 1.000000e-24 : f32
      %42 = vector.broadcast %cst_33 : f32 to vector<2x1xf32>
      %43 = arith.maximumf %41, %42 : vector<2x1xf32>
      %44 = math.rsqrt %43 : vector<2x1xf32>
      %45 = vector.broadcast %44 : vector<2x1xf32> to vector<2x256xf32>
      %46 = arith.mulf %38, %45 : vector<2x256xf32>
      %c0_34 = arith.constant 0 : index
      %c0_35 = arith.constant 0 : index
      %47 = vector.load %arg8[%c0_34, %c0_35] : memref<2x256xf32, #tpu.memory_space<vmem>>, vector<2x256xf32>
      tpu.vector_store %arg8[%c0_34, %c0_35], %46 {strides = array<i32>} : memref<2x256xf32, #tpu.memory_space<vmem>>, vector<2x256xf32>,
    } else {
    }
    return
  }
  func.func @transform_0(%arg0: i32, %arg1: i32) -> (i32, i32, i32) {
    %c0_i32 = arith.constant 0 : i32
    %c0_i32_0 = arith.constant 0 : i32
    return %arg0, %arg1, %c0_i32 : i32, i32, i32
  }
  func.func @transform_1(%arg0: i32, %arg1: i32) -> (i32, i32) {
    %c0_i32 = arith.constant 0 : i32
    return %arg0, %arg1 : i32, i32
  }
  func.func @transform_2(%arg0: i32, %arg1: i32) -> (i32, i32) {
    %c0_i32 = arith.constant 0 : i32
    %c0_i32_0 = arith.constant 0 : i32
    %c0_i32_1 = arith.constant 0 : i32
    return %c0_i32, %c0_i32_0 : i32, i32
  }
  func.func @transform_3(%arg0: i32, %arg1: i32) -> (i32, i32) {
    %c0_i32 = arith.constant 0 : i32
    %c0_i32_0 = arith.constant 0 : i32
    %c0_i32_1 = arith.constant 0 : i32
    return %c0_i32, %c0_i32_0 : i32, i32
  }
  func.func @transform_4(%arg0: i32, %arg1: i32) -> (i32, i32) {
    %c0_i32 = arith.constant 0 : i32
    %c0_i32_0 = arith.constant 0 : i32
    %c0_i32_1 = arith.constant 0 : i32
    return %c0_i32, %c0_i32_0 : i32, i32
  }
  func.func @transform_5(%arg0: i32, %arg1: i32) -> (i32, i32) {
    %c0_i32 = arith.constant 0 : i32
    %c0_i32_0 = arith.constant 0 : i32
    %c0_i32_1 = arith.constant 0 : i32
    return %c0_i32, %c0_i32_0 : i32, i32
  }
  func.func @transform_6(%arg0: i32, %arg1: i32) -> (i32, i32) {
    %c0_i32 = arith.constant 0 : i32
    %c0_i32_0 = arith.constant 0 : i32
    return %arg0, %c0_i32 : i32, i32
  }
}

</mosaic_0001>

<bundles_post_ra>
// kernel: tpu_custom_call.1
= control target key start
LH: loop header
LB: loop body
LE: loop exit
PB: predicated region body
PF: predicated region fallthrough
CT: control target
= control target key end

     0   :  { %11 = vsyncpa [#allocation5], 0  ;;  %s888_s0 = inlined_call_operand.hbm [shape: bf16[2,8,32], index: 0, kind: input, shape index: {}]   ;;  %s889_s1 = inlined_call_operand.hbm [shape: f32[2,8], index: 1, kind: input, shape index: {}]   ;;  %s890_s2 = inlined_call_operand.hbm [shape: f32[32,512], index: 2, kind: input, shape index: {}]   ;;  %s891_s3 = inlined_call_operand.vmem [shape: f32[1,512], index: 3, kind: input, shape index: {}]   ;;  %s892_s4 = inlined_call_operand.hbm [shape: f32[512,256], index: 4, kind: input, shape index: {}]   ;;  %s893_s5 = inlined_call_operand.vmem [shape: f32[1,256], index: 5, kind: input, shape index: {}]   ;;  %s894_s6 = inlined_call_operand.hbm [shape: f32[2,256], index: 6, kind: output, shape index: {}]  }
   0x1   :  { %12 = vsyncpa [#allocation8], 0 }
   0x2   :  { %13 = vsyncpa [#allocation11], 0 }
   0x3   :  { %14 = vsyncpa [#allocation6], 0  ;;  %s795_s21 = smov [#allocation7]   ;;  %s796_s23 = smov [#allocation4]  }
   0x4   :  { %s33_s22 = sshll.u32 %s795_s21, 4  ;;  %s20_s24 = sshll.u32 %s796_s23, 4  ;;  %s34_s22 = int_to_ptr.vmem [resolvable:$true] %s33_s22  ;;  %s21_s24 = int_to_ptr.vmem [resolvable:$true] %s20_s24 }
   0x5   :  { %s695_s25 = scalar_lea.vmem %s34_s22, 32  ;;  %p700_p1 = scmp.lt.s32.totalorder %s34_s22, %s34_s22 }
   0x6   :  { %p696_p0 = scmp.ne.s32.totalorder %s34_s22, %s695_s25  ;;  %p701_p2 = scmp.lt.s32.totalorder %s695_s25, %s695_s25 }
   0x8   :  { %p702_p3 = por %p701_p2, %p700_p1 }
   0xa   :  { %p703_p4 = pnand %p702_p3, %p696_p0 }
   0xc   :  { %706 = shalt.err (!%p703_p4)
}
   0xd   :  { %36 = dma.hbm_to_vmem [thread:$0]  %s889_s1, 32, %s34_s22, [#allocation8]  }
   0xe   :  { %s715_s28 = scalar_lea.vmem %s21_s24, 128  ;;  %p720_p6 = scmp.lt.s32.totalorder %s21_s24, %s21_s24 }
   0xf   :  { %p716_p5 = scmp.ne.s32.totalorder %s21_s24, %s715_s28  ;;  %p721_p7 = scmp.lt.s32.totalorder %s715_s28, %s715_s28 }
  0x11   :  { %p722_p8 = por %p721_p7, %p720_p6 }
  0x13   :  { %p723_p9 = pnand %p722_p8, %p716_p5 }
  0x15   :  { %726 = shalt.err (!%p723_p9)
}
  0x16   :  { %s797_s29 = smov 64   ;;  %s798_s30 = smov 4  }
  0x17   :  { %26 = dma.hbm_to_vmem [thread:$0]  %s888_s0, 128, %s21_s24, [#allocation5], %s797_s29, %s797_s29, %s798_s30  }
  0x18   :  { %s799_s9 = smov [#allocation9]  }
  0x19   :  { %s42_s10 = sshll.u32 %s799_s9, 4  ;;  %s43_s10 = int_to_ptr.vmem [resolvable:$true] %s42_s10 }
  0x1a   :  { %s735_s11 = scalar_lea.vmem %s43_s10, 2048  ;;  %p740_p11 = scmp.lt.s32.totalorder %s43_s10, %s43_s10 }
  0x1b   :  { %p736_p10 = scmp.ne.s32.totalorder %s43_s10, %s735_s11  ;;  %p741_p12 = scmp.lt.s32.totalorder %s735_s11, %s735_s11 }
  0x1d   :  { %p742_p13 = por %p741_p12, %p740_p11 }
  0x1f   :  { %p743_p0 = pnand %p742_p13, %p736_p10 }
  0x21   :  { %746 = shalt.err (!%p743_p0)
}
  0x22   :  { %s800_s1 = smov 512   ;;  %s801_s12 = smov 32  }
  0x23   :  { %48 = dma.hbm_to_vmem [thread:$0]  %s890_s2, 2048, %s43_s10, [#allocation8], %s800_s1, %s800_s1, %s801_s12  }
  0x24   :  { %s802_s15 = smov [#allocation10]  }
  0x25   :  { %s56_s16 = sshll.u32 %s802_s15, 4  ;;  %s57_s16 = int_to_ptr.vmem [resolvable:$true] %s56_s16 }
  0x26   :  { %s755_s0 = scalar_lea.vmem %s57_s16, 16384  ;;  %p760_p2 = scmp.lt.s32.totalorder %s57_s16, %s57_s16 }
  0x27   :  { %p756_p1 = scmp.ne.s32.totalorder %s57_s16, %s755_s0  ;;  %p761_p3 = scmp.lt.s32.totalorder %s755_s0, %s755_s0 }
  0x29   :  { %p762_p4 = por %p761_p3, %p760_p2 }
  0x2b   :  { %p763_p5 = pnand %p762_p4, %p756_p1 }
  0x2d   :  { %766 = shalt.err (!%p763_p5)
}
  0x2e   :  { %s803_s17 = smov 256   ;;  %s804_s18 = smov 16  }
  0x2f   :  { %62 = dma.hbm_to_vmem [thread:$0]  %s892_s4, 16384, %s57_s16, [#allocation11], %s803_s17, %s803_s17, %s804_s18  }
  0x30   :  { %787 = dma.done.wait [#allocation5], 128  }
  0x31   :  { %788 = vsyncadd [#allocation5], 4294967168 }
  0x32   :  { %789 = dma.done.wait [#allocation8], 2080  }
  0x33   :  { %790 = vsyncadd [#allocation8], 4294965216 }
  0x34   :  { %791 = dma.done.wait [#allocation11], 16384  }
  0x35   :  { %792 = vsyncadd [#allocation11], 4294950912  ;;  %vm81_vm0 = vcmask 254976   ;;  %vm83_vm1 = vcmask 1024   ;;  %v805_v0 = vmov 0.0   ;;  %vm131_vm2 = vcmask 58368  }
  0x36   :  { %82 = vst.msk [vmem:[#allocation2] sm:$0x3] %vm81_vm0, %v805_v0  ;;  %256 = vmatprep.mubr.f32.mxu0 %v805_v0  ;;  %327 = vmatprep.mubr.f32.mxu1 %v805_v0  ;;  %v87_v1 = vld [vmem:[#allocation7] sm:$0x3]  ;;  %v91_v3 = vlaneseq  ;;  %v806_v7 = vmov 0   ;;  %v665_v10 = vld [vmem:[#allocation4] sm:$0xff]  }
  0x37   :  { %84 = vst.msk [vmem:[#allocation3] sm:$0x3] %vm83_vm1, %v805_v0  ;;  %v132_v2 = vsel %vm131_vm2, %v87_v1, 0.0  ;;  %681 = vset.pattern.permute.xlu1 %v806_v7  ;;  %682 = vset.pattern.permute.xlu0 %v806_v7  ;;  %v667_v11 = vunpack.c.h.bf16 %v665_v10  ;;  %vm107_vm3 = vcmask 261120   ;;  %v666_v20 = vunpack.c.l.bf16 %v665_v10  ;;  %v164_v27 = vld [vmem:[#allocation9 + $0x68] sm:$0xff]  ;;  %v166_v28 = vld [vmem:[#allocation9 + $0x78] sm:$0xff] }
  0x38   :  { %133 = vadd.xlane.f32.xlu0 %v132_v2  ;;  %v857_v4 = vshrl.u32 %v91_v3, 7  ;;  %v163_v29 = vld [vmem:[#allocation9 + $0x60] sm:$0xff]  ;;  %216 = vmatprep.subr.mxu0 %v164_v27  ;;  %v165_v32 = vld [vmem:[#allocation9 + $0x70] sm:$0xff]  ;;  %v160_v33 = vld [vmem:[#allocation9 + $0x48] sm:$0xff]  ;;  %vm124_vm4 = vcmask 1041409   ;;  %vm622_vm5 = vcmask 1041408  }
  0x39   :  { %287 = vmatprep.subr.mxu1 %v166_v28  ;;  %217 = vmatpush1.msra.mxu0 %v163_v29  ;;  %v162_v35 = vld [vmem:[#allocation9 + $0x58] sm:$0xff]  ;;  %v159_v36 = vld [vmem:[#allocation9 + $0x40] sm:$0xff]  ;;  %v161_v37 = vld [vmem:[#allocation9 + $0x50] sm:$0xff] }
  0x3a   :  { %v860_v5 = vsub.s32 1, %v857_v4  ;;  %v864_v8 = vsub.s32 0, %v857_v4  ;;  %288 = vmatpush1.msra.mxu1 %v165_v32  ;;  %218 = vmatprep.subr.mxu0 %v160_v33  ;;  %v156_v40 = vld [vmem:[#allocation9 + $0x28] sm:$0xff]  ;;  %v158_v41 = vld [vmem:[#allocation9 + $0x38] sm:$0xff]  ;;  %v155_v42 = vld [vmem:[#allocation9 + $0x20] sm:$0xff] }
  0x3b   :  { %289 = vmatprep.subr.mxu1 %v162_v35  ;;  %219 = vmatpush1.msra.mxu0 %v159_v36  ;;  %v157_v43 = vld [vmem:[#allocation9 + $0x30] sm:$0xff]  ;;  %v152_v44 = vld [vmem:[#allocation9 + $0x8] sm:$0xff]  ;;  %v154_v46 = vld [vmem:[#allocation9 + $0x18] sm:$0xff] }
  0x3c   :  { %v101_v6 = vrot.slane %v87_v1, %v860_v5  ;;  %v94_v9 = vrot.slane %v87_v1, %v864_v8  ;;  %290 = vmatpush1.msra.mxu1 %v161_v37  ;;  %220 = vmatprep.subr.mxu0 %v156_v40  ;;  %v151_v47 = vld [vmem:[#allocation9] sm:$0xff]  ;;  %v153_v48 = vld [vmem:[#allocation9 + $0x10] sm:$0xff]  ;;  %v369_v55 = vld [vmem:[#allocation10 + $0xf8] sm:$0xff] }
  0x3d   :  { %291 = vmatprep.subr.mxu1 %v158_v41  ;;  %221 = vmatpush1.msra.mxu0 %v155_v42  ;;  %v90_v51 = vld [vmem:[#allocation2] sm:$0x3]  ;;  %v433_v56 = vld [vmem:[#allocation10 + $0x2f8] sm:$0xff]  ;;  %v367_v63 = vld [vmem:[#allocation10 + $0xe8] sm:$0xff] }
  0x3e   :  { %103 = vbcast.lane.b32.xlu1 %v101_v6, 256  ;;  %v130_v16 = vld [vmem:[#allocation3] sm:$0x3]  ;;  %292 = vmatpush1.msra.mxu1 %v157_v43  ;;  %v431_v0 = vld [vmem:[#allocation10 + $0x2e8] sm:$0xff]  ;;  %v366_v1 = vld [vmem:[#allocation10 + $0xe0] sm:$0xff] }
  0x3f   :  { %222 = vmatprep.subr.mxu0 %v152_v44  ;;  %293 = vmatprep.subr.mxu1 %v154_v46  ;;  %v368_v61 = vld [vmem:[#allocation10 + $0xf0] sm:$0xff]  ;;  %v430_v2 = vld [vmem:[#allocation10 + $0x2e0] sm:$0xff]  ;;  %v365_v3 = vld [vmem:[#allocation10 + $0xd8] sm:$0xff] }
  0x40   :  { %223 = vmatpush1.msra.mxu0 %v151_v47  ;;  %294 = vmatpush1.msra.mxu1 %v153_v48  ;;  %v432_v62 = vld [vmem:[#allocation10 + $0x2f0] sm:$0xff]  ;;  %v429_v6 = vld [vmem:[#allocation10 + $0x2d8] sm:$0xff]  ;;  %v363_v10 = vld [vmem:[#allocation10 + $0xc8] sm:$0xff] }
  0x41   :  { %478 = vmatprep.subr.mxu0 %v369_v55  ;;  %549 = vmatprep.subr.mxu1 %v433_v56  ;;  %v364_v7 = vld [vmem:[#allocation10 + $0xd0] sm:$0xff]  ;;  %v419_v27 = vld [vmem:[#allocation10 + $0x288] sm:$0xff]  ;;  %v354_v28 = vld [vmem:[#allocation10 + $0x80] sm:$0xff] }
  0x42   :  { %v418_v29 = vld [vmem:[#allocation10 + $0x280] sm:$0xff]  ;;  %v352_v32 = vld [vmem:[#allocation10 + $0x70] sm:$0xff]  ;;  %v415_v35 = vld [vmem:[#allocation10 + $0x268] sm:$0xff] }
  0x43   :  { %v416_v33 = vld [vmem:[#allocation10 + $0x270] sm:$0xff]  ;;  %v350_v36 = vld [vmem:[#allocation10 + $0x60] sm:$0xff]  ;;  %v347_v42 = vld [vmem:[#allocation10 + $0x48] sm:$0xff] }
  0x44   :  { %v414_v37 = vld [vmem:[#allocation10 + $0x260] sm:$0xff]  ;;  %v348_v40 = vld [vmem:[#allocation10 + $0x50] sm:$0xff]  ;;  %v411_v43 = vld [vmem:[#allocation10 + $0x248] sm:$0xff] }
  0x45   :  { %v412_v41 = vld [vmem:[#allocation10 + $0x250] sm:$0xff]  ;;  %v346_v44 = vld [vmem:[#allocation10 + $0x40] sm:$0xff]  ;;  %v345_v46 = vld [vmem:[#allocation10 + $0x38] sm:$0xff] }
  0x46   :  { %v409_v47 = vld [vmem:[#allocation10 + $0x238] sm:$0xff]  ;;  %v344_v48 = vld [vmem:[#allocation10 + $0x30] sm:$0xff] }
  0x47   :  { %v405_v55 = vld [vmem:[#allocation10 + $0x218] sm:$0xff]  ;;  %v340_v56 = vld [vmem:[#allocation10 + $0x10] sm:$0xff] }
  0x4e   :  { %96 = vbcast.lane.b32.xlu0 %v94_v9, 256  ;;  %v428_v9 = vld [vmem:[#allocation10 + $0x2d0] sm:$0xff] }
  0xb0   :  { %v104_v12 = vpop.permute.xlu1 %103 }
  0xb1   :  { %v106_v13 = vmul.f32 %v667_v11, %v104_v12  ;;  %v427_v11 = vld [vmem:[#allocation10 + $0x2c8] sm:$0xff]  ;;  %v362_v12 = vld [vmem:[#allocation10 + $0xc0] sm:$0xff] }
  0xb3   :  { %v115_v14 = vsel %vm107_vm3, %v106_v13, 0.0  ;;  %v426_v13 = vld [vmem:[#allocation10 + $0x2c0] sm:$0xff] }
  0xb4   :  { %v116_v15 = vrot.slane %v115_v14, 4 }
  0xb6   :  { %v117_v18 = vadd.f32 %v116_v15, %v115_v14  ;;  %v361_v14 = vld [vmem:[#allocation10 + $0xb8] sm:$0xff] }
  0xb7   :  { %v425_v15 = vld [vmem:[#allocation10 + $0x2b8] sm:$0xff] }
  0xb8   :  { %v118_v21 = vrot.slane %v117_v18, 2 }
  0xba   :  { %v119_v25 = vadd.f32 %v118_v21, %v117_v18  ;;  %v359_v18 = vld [vmem:[#allocation10 + $0xa8] sm:$0xff]  ;;  %v422_v21 = vld [vmem:[#allocation10 + $0x2a0] sm:$0xff] }
  0xbc   :  { %v120_v38 = vrot.slane %v119_v25, 1 }
  0xbe   :  { %v121_v49 = vadd.f32 %v120_v38, %v119_v25  ;;  %v420_v25 = vld [vmem:[#allocation10 + $0x290] sm:$0xff]  ;;  %v349_v38 = vld [vmem:[#allocation10 + $0x58] sm:$0xff] }
  0xc1   :  { %v134_v17 = vpop.xlane.xlu0 %133 }
  0xc2   :  { %v135_v19 = vadd.f32 %v134_v17, %v130_v16  ;;  %v360_v16 = vld [vmem:[#allocation10 + $0xb0] sm:$0xff] }
  0xc3   :  { %v424_v17 = vld [vmem:[#allocation10 + $0x2b0] sm:$0xff] }
  0xc4   :  { %137 = vst.msk [vmem:[#allocation3] sm:$0x3] %vm83_vm1, %v135_v19  ;;  %v423_v19 = vld [vmem:[#allocation10 + $0x2a8] sm:$0xff] }
  0xc5   :  { %v97_v22 = vpop.permute.xlu0 %96 }
  0xc6   :  { %v105_v23 = vmul.f32 %v666_v20, %v97_v22  ;;  %v358_v20 = vld [vmem:[#allocation10 + $0xa0] sm:$0xff]  ;;  %v357_v22 = vld [vmem:[#allocation10 + $0x98] sm:$0xff] }
  0xc8   :  { %v108_v24 = vsel %vm107_vm3, %v105_v23, 0.0  ;;  %v421_v23 = vld [vmem:[#allocation10 + $0x298] sm:$0xff] }
  0xc9   :  { %v109_v26 = vrot.slane %v108_v24, 4 }
  0xcb   :  { %v142_v30 = vld [vmem:[#allocation3] sm:$0x3]  ;;  %v110_v31 = vadd.f32 %v109_v26, %v108_v24  ;;  %v355_v26 = vld [vmem:[#allocation10 + $0x88] sm:$0xff] }
  0xcc   :  { %v143_v34 = vmax.f32 %v142_v30, 1.0  ;;  %v356_v24 = vld [vmem:[#allocation10 + $0x90] sm:$0xff]  ;;  %v353_v30 = vld [vmem:[#allocation10 + $0x78] sm:$0xff] }
  0xcd   :  { %v111_v39 = vrot.slane %v110_v31, 2 }
  0xce   :  { %146 = vperm.xlu1 %681, %v143_v34   ;;  %v351_v34 = vld [vmem:[#allocation10 + $0x68] sm:$0xff] }
  0xcf   :  { %v112_v45 = vadd.f32 %v111_v39, %v110_v31  ;;  %v417_v31 = vld [vmem:[#allocation10 + $0x278] sm:$0xff] }
  0xd0   :  { %v413_v39 = vld [vmem:[#allocation10 + $0x258] sm:$0xff] }
  0xd1   :  { %v113_v50 = vrot.slane %v112_v45, 1 }
  0xd3   :  { %v114_v52 = vadd.f32 %v113_v50, %v112_v45  ;;  %v410_v45 = vld [vmem:[#allocation10 + $0x240] sm:$0xff]  ;;  %v343_v50 = vld [vmem:[#allocation10 + $0x28] sm:$0xff] }
  0xd5   :  { %v125_v53 = vsel %vm124_vm4, %v121_v49, %v114_v52  ;;  %v408_v49 = vld [vmem:[#allocation10 + $0x230] sm:$0xff]  ;;  %v342_v52 = vld [vmem:[#allocation10 + $0x20] sm:$0xff] }
  0xd6   :  { %v127_v54 = vadd.f32 %v125_v53, %v90_v51  ;;  %v407_v51 = vld [vmem:[#allocation10 + $0x228] sm:$0xff]  ;;  %v406_v53 = vld [vmem:[#allocation10 + $0x220] sm:$0xff] }
  0xd8   :  { %129 = vst.msk [vmem:[#allocation2] sm:$0x3] %vm81_vm0, %v127_v54  ;;  %v341_v54 = vld [vmem:[#allocation10 + $0x18] sm:$0xff] }
  0xdf   :  { %v141_v59 = vld [vmem:[#allocation2] sm:$0x3] }
 0x149   :  { %v147_v57 = vpop.permute.xlu1 %146 }
 0x14a   :  { %683 = vrcp.f32 %v147_v57  ;;  %v404_v57 = vld [vmem:[#allocation10 + $0x210] sm:$0xff] }
 0x157   :  { %v684_v58 = vpop.eup %683 }
 0x158   :  { %v150_v60 = vmul.f32 %v684_v58, %v141_v59  ;;  %v339_v58 = vld [vmem:[#allocation10 + $0x8] sm:$0xff] }
 0x159   :  { %v403_v59 = vld [vmem:[#allocation10 + $0x208] sm:$0xff] }
 0x15a   :  { %661 = vmatmul.mubr.msk.f32.vlgmr.msra.gmra.mxu0 %vm107_vm3, %v150_v60  ;;  %662 = vmatmul.mubr.msk.f32.vlgmr.msra.gmra.mxu1 %vm107_vm3, %v150_v60  ;;  %v338_v60 = vld [vmem:[#allocation10] sm:$0xff] }
 0x15b   :  { %479 = vmatpush1.msra.mxu0 %v368_v61  ;;  %550 = vmatpush1.msra.mxu1 %v432_v62  ;;  %v402_v61 = vld [vmem:[#allocation10 + $0x200] sm:$0xff]  ;;  %v401_v62 = vld [vmem:[#allocation10 + $0x1f8] sm:$0xff] }
 0x15c   :  { %480 = vmatprep.subr.mxu0 %v367_v63  ;;  %551 = vmatprep.subr.mxu1 %v431_v0  ;;  %v465_v63 = vld [vmem:[#allocation10 + $0x3f8] sm:$0xff]  ;;  %v400_v0 = vld [vmem:[#allocation10 + $0x1f0] sm:$0xff] }
 0x15d   :  { %481 = vmatpush1.msra.mxu0 %v366_v1  ;;  %552 = vmatpush1.msra.mxu1 %v430_v2  ;;  %v464_v1 = vld [vmem:[#allocation10 + $0x3f0] sm:$0xff]  ;;  %v399_v2 = vld [vmem:[#allocation10 + $0x1e8] sm:$0xff] }
 0x15e   :  { %482 = vmatprep.subr.mxu0 %v365_v3  ;;  %553 = vmatprep.subr.mxu1 %v429_v6  ;;  %v463_v3 = vld [vmem:[#allocation10 + $0x3e8] sm:$0xff]  ;;  %v398_v6 = vld [vmem:[#allocation10 + $0x1e0] sm:$0xff] }
 0x15f   :  { %483 = vmatpush1.msra.mxu0 %v364_v7  ;;  %554 = vmatpush1.msra.mxu1 %v428_v9  ;;  %v462_v7 = vld [vmem:[#allocation10 + $0x3e0] sm:$0xff]  ;;  %v397_v9 = vld [vmem:[#allocation10 + $0x1d8] sm:$0xff] }
 0x160   :  { %484 = vmatprep.subr.mxu0 %v363_v10  ;;  %555 = vmatprep.subr.mxu1 %v427_v11  ;;  %v461_v10 = vld [vmem:[#allocation10 + $0x3d8] sm:$0xff]  ;;  %v396_v11 = vld [vmem:[#allocation10 + $0x1d0] sm:$0xff] }
 0x161   :  { %485 = vmatpush1.msra.mxu0 %v362_v12  ;;  %556 = vmatpush1.msra.mxu1 %v426_v13  ;;  %v460_v12 = vld [vmem:[#allocation10 + $0x3d0] sm:$0xff]  ;;  %v395_v13 = vld [vmem:[#allocation10 + $0x1c8] sm:$0xff] }
 0x162   :  { %486 = vmatprep.subr.mxu0 %v361_v14  ;;  %557 = vmatprep.subr.mxu1 %v425_v15  ;;  %v459_v14 = vld [vmem:[#allocation10 + $0x3c8] sm:$0xff]  ;;  %v394_v15 = vld [vmem:[#allocation10 + $0x1c0] sm:$0xff] }
 0x163   :  { %487 = vmatpush1.msra.mxu0 %v360_v16  ;;  %558 = vmatpush1.msra.mxu1 %v424_v17  ;;  %v458_v16 = vld [vmem:[#allocation10 + $0x3c0] sm:$0xff]  ;;  %v393_v17 = vld [vmem:[#allocation10 + $0x1b8] sm:$0xff] }
 0x164   :  { %488 = vmatprep.subr.mxu0 %v359_v18  ;;  %559 = vmatprep.subr.mxu1 %v423_v19  ;;  %v457_v18 = vld [vmem:[#allocation10 + $0x3b8] sm:$0xff]  ;;  %v392_v19 = vld [vmem:[#allocation10 + $0x1b0] sm:$0xff] }
 0x165   :  { %489 = vmatpush1.msra.mxu0 %v358_v20  ;;  %560 = vmatpush1.msra.mxu1 %v422_v21  ;;  %v456_v20 = vld [vmem:[#allocation10 + $0x3b0] sm:$0xff]  ;;  %v391_v21 = vld [vmem:[#allocation10 + $0x1a8] sm:$0xff] }
 0x166   :  { %490 = vmatprep.subr.mxu0 %v357_v22  ;;  %561 = vmatprep.subr.mxu1 %v421_v23  ;;  %v455_v22 = vld [vmem:[#allocation10 + $0x3a8] sm:$0xff]  ;;  %v390_v23 = vld [vmem:[#allocation10 + $0x1a0] sm:$0xff] }
 0x167   :  { %491 = vmatpush1.msra.mxu0 %v356_v24  ;;  %562 = vmatpush1.msra.mxu1 %v420_v25  ;;  %v454_v24 = vld [vmem:[#allocation10 + $0x3a0] sm:$0xff]  ;;  %v389_v25 = vld [vmem:[#allocation10 + $0x198] sm:$0xff] }
 0x168   :  { %492 = vmatprep.subr.mxu0 %v355_v26  ;;  %563 = vmatprep.subr.mxu1 %v419_v27  ;;  %v453_v26 = vld [vmem:[#allocation10 + $0x398] sm:$0xff]  ;;  %v388_v27 = vld [vmem:[#allocation10 + $0x190] sm:$0xff] }
 0x169   :  { %493 = vmatpush1.msra.mxu0 %v354_v28  ;;  %564 = vmatpush1.msra.mxu1 %v418_v29  ;;  %v452_v28 = vld [vmem:[#allocation10 + $0x390] sm:$0xff]  ;;  %v387_v29 = vld [vmem:[#allocation10 + $0x188] sm:$0xff] }
 0x16a   :  { %494 = vmatprep.subr.mxu0 %v353_v30  ;;  %565 = vmatprep.subr.mxu1 %v417_v31  ;;  %v451_v30 = vld [vmem:[#allocation10 + $0x388] sm:$0xff]  ;;  %v386_v31 = vld [vmem:[#allocation10 + $0x180] sm:$0xff] }
 0x16b   :  { %495 = vmatpush1.msra.mxu0 %v352_v32  ;;  %566 = vmatpush1.msra.mxu1 %v416_v33  ;;  %v450_v32 = vld [vmem:[#allocation10 + $0x380] sm:$0xff]  ;;  %v385_v33 = vld [vmem:[#allocation10 + $0x178] sm:$0xff] }
 0x16c   :  { %496 = vmatprep.subr.mxu0 %v351_v34  ;;  %567 = vmatprep.subr.mxu1 %v415_v35  ;;  %v449_v34 = vld [vmem:[#allocation10 + $0x378] sm:$0xff]  ;;  %v384_v35 = vld [vmem:[#allocation10 + $0x170] sm:$0xff] }
 0x16d   :  { %497 = vmatpush1.msra.mxu0 %v350_v36  ;;  %568 = vmatpush1.msra.mxu1 %v414_v37  ;;  %v448_v36 = vld [vmem:[#allocation10 + $0x370] sm:$0xff]  ;;  %v383_v37 = vld [vmem:[#allocation10 + $0x168] sm:$0xff] }
 0x16e   :  { %498 = vmatprep.subr.mxu0 %v349_v38  ;;  %569 = vmatprep.subr.mxu1 %v413_v39  ;;  %v447_v38 = vld [vmem:[#allocation10 + $0x368] sm:$0xff]  ;;  %v382_v39 = vld [vmem:[#allocation10 + $0x160] sm:$0xff] }
 0x16f   :  { %499 = vmatpush1.msra.mxu0 %v348_v40  ;;  %570 = vmatpush1.msra.mxu1 %v412_v41  ;;  %v446_v40 = vld [vmem:[#allocation10 + $0x360] sm:$0xff]  ;;  %v381_v41 = vld [vmem:[#allocation10 + $0x158] sm:$0xff] }
 0x170   :  { %500 = vmatprep.subr.mxu0 %v347_v42  ;;  %571 = vmatprep.subr.mxu1 %v411_v43  ;;  %v445_v42 = vld [vmem:[#allocation10 + $0x358] sm:$0xff]  ;;  %v380_v43 = vld [vmem:[#allocation10 + $0x150] sm:$0xff] }
 0x171   :  { %501 = vmatpush1.msra.mxu0 %v346_v44  ;;  %572 = vmatpush1.msra.mxu1 %v410_v45  ;;  %v444_v44 = vld [vmem:[#allocation10 + $0x350] sm:$0xff]  ;;  %v379_v45 = vld [vmem:[#allocation10 + $0x148] sm:$0xff] }
 0x172   :  { %502 = vmatprep.subr.mxu0 %v345_v46  ;;  %573 = vmatprep.subr.mxu1 %v409_v47  ;;  %v443_v46 = vld [vmem:[#allocation10 + $0x348] sm:$0xff]  ;;  %v378_v47 = vld [vmem:[#allocation10 + $0x140] sm:$0xff] }
 0x173   :  { %503 = vmatpush1.msra.mxu0 %v344_v48  ;;  %574 = vmatpush1.msra.mxu1 %v408_v49  ;;  %v442_v48 = vld [vmem:[#allocation10 + $0x340] sm:$0xff]  ;;  %v377_v49 = vld [vmem:[#allocation10 + $0x138] sm:$0xff] }
 0x174   :  { %504 = vmatprep.subr.mxu0 %v343_v50  ;;  %575 = vmatprep.subr.mxu1 %v407_v51  ;;  %v441_v50 = vld [vmem:[#allocation10 + $0x338] sm:$0xff]  ;;  %v376_v51 = vld [vmem:[#allocation10 + $0x130] sm:$0xff] }
 0x175   :  { %505 = vmatpush1.msra.mxu0 %v342_v52  ;;  %576 = vmatpush1.msra.mxu1 %v406_v53  ;;  %v440_v52 = vld [vmem:[#allocation10 + $0x330] sm:$0xff]  ;;  %v375_v53 = vld [vmem:[#allocation10 + $0x128] sm:$0xff] }
 0x176   :  { %506 = vmatprep.subr.mxu0 %v341_v54  ;;  %577 = vmatprep.subr.mxu1 %v405_v55  ;;  %v439_v54 = vld [vmem:[#allocation10 + $0x328] sm:$0xff]  ;;  %v374_v55 = vld [vmem:[#allocation10 + $0x120] sm:$0xff] }
 0x177   :  { %507 = vmatpush1.msra.mxu0 %v340_v56  ;;  %578 = vmatpush1.msra.mxu1 %v404_v57  ;;  %v438_v56 = vld [vmem:[#allocation10 + $0x320] sm:$0xff]  ;;  %v373_v57 = vld [vmem:[#allocation10 + $0x118] sm:$0xff] }
 0x178   :  { %508 = vmatprep.subr.mxu0 %v339_v58  ;;  %579 = vmatprep.subr.mxu1 %v403_v59  ;;  %v437_v58 = vld [vmem:[#allocation10 + $0x318] sm:$0xff]  ;;  %v372_v59 = vld [vmem:[#allocation10 + $0x110] sm:$0xff] }
 0x179   :  { %509 = vmatpush1.msra.mxu0 %v338_v60  ;;  %580 = vmatpush1.msra.mxu1 %v402_v61  ;;  %v436_v60 = vld [vmem:[#allocation10 + $0x310] sm:$0xff]  ;;  %v371_v61 = vld [vmem:[#allocation10 + $0x108] sm:$0xff] }
 0x17a   :  { %510 = vmatprep.subr.mxu0 %v401_v62  ;;  %581 = vmatprep.subr.mxu1 %v465_v63  ;;  %v435_v62 = vld [vmem:[#allocation10 + $0x308] sm:$0xff]  ;;  %v370_v63 = vld [vmem:[#allocation10 + $0x100] sm:$0xff] }
 0x17b   :  { %511 = vmatpush2.msra.mxu0 %v400_v0  ;;  %582 = vmatpush2.msra.mxu1 %v464_v1  ;;  %v434_v0 = vld [vmem:[#allocation10 + $0x300] sm:$0xff]  ;;  %v179_v1 = vsub.s32 2, %v857_v4 }
 0x17c   :  { %512 = vmatprep.subr.mxu0 %v399_v2  ;;  %583 = vmatprep.subr.mxu1 %v463_v3  ;;  %v167_v2 = vld [vmem:[%s891_s3] sm:$0xf]  ;;  %v183_v3 = vsub.s32 3, %v857_v4 }
 0x17d   :  { %513 = vmatpush2.msra.mxu0 %v398_v6  ;;  %584 = vmatpush2.msra.mxu1 %v462_v7  ;;  %v172_v6 = vrot.slane %v167_v2, %v864_v8  ;;  %v180_v7 = vrot.slane %v167_v2, %v179_v1  ;;  %v466_v4 = vld [vmem:[%s893_s5] sm:$0x3]  ;;  %s807_s5 = smov [#allocation12]  }
 0x17e   :  { %514 = vmatprep.subr.mxu0 %v397_v9  ;;  %585 = vmatprep.subr.mxu1 %v461_v10  ;;  %v176_v9 = vrot.slane %v167_v2, %v860_v5  ;;  %v184_v10 = vrot.slane %v167_v2, %v183_v3  ;;  %s650_s22 = sshll.u32 %s807_s5, 4  ;;  %s651_s22 = int_to_ptr.vmem [resolvable:$true] %s650_s22 }
 0x17f   :  { %515 = vmatpush2.msra.mxu0 %v396_v11  ;;  %586 = vmatpush2.msra.mxu1 %v460_v12  ;;  %s767_s23 = scalar_lea.vmem %s651_s22, 64  ;;  %p772_p7 = scmp.lt.s32.totalorder %s651_s22, %s651_s22 }
 0x180   :  { %516 = vmatprep.subr.mxu0 %v395_v13  ;;  %587 = vmatprep.subr.mxu1 %v459_v14  ;;  %p768_p6 = scmp.ne.s32.totalorder %s651_s22, %s767_s23  ;;  %p773_p8 = scmp.lt.s32.totalorder %s767_s23, %s767_s23 }
 0x181   :  { %517 = vmatpush2.msra.mxu0 %v394_v15  ;;  %588 = vmatpush2.msra.mxu1 %v458_v16 }
 0x182   :  { %518 = vmatprep.subr.mxu0 %v393_v17  ;;  %589 = vmatprep.subr.mxu1 %v457_v18  ;;  %p774_p9 = por %p773_p8, %p772_p7 }
 0x183   :  { %519 = vmatpush2.msra.mxu0 %v392_v19  ;;  %590 = vmatpush2.msra.mxu1 %v456_v20 }
 0x184   :  { %520 = vmatprep.subr.mxu0 %v391_v21  ;;  %591 = vmatprep.subr.mxu1 %v455_v22  ;;  %p775_p10 = pnand %p774_p9, %p768_p6 }
 0x185   :  { %521 = vmatpush2.msra.mxu0 %v390_v23  ;;  %592 = vmatpush2.msra.mxu1 %v454_v24  ;;  %v471_v23 = vrot.slane %v466_v4, %v864_v8  ;;  %v475_v24 = vrot.slane %v466_v4, %v860_v5 }
 0x186   :  { %522 = vmatprep.subr.mxu0 %v389_v25  ;;  %593 = vmatprep.subr.mxu1 %v453_v26 }
 0x187   :  { %523 = vmatpush2.msra.mxu0 %v388_v27  ;;  %594 = vmatpush2.msra.mxu1 %v452_v28 }
 0x188   :  { %524 = vmatprep.subr.mxu0 %v387_v29  ;;  %595 = vmatprep.subr.mxu1 %v451_v30 }
 0x189   :  { %525 = vmatpush2.msra.mxu0 %v386_v31  ;;  %596 = vmatpush2.msra.mxu1 %v450_v32 }
 0x18a   :  { %526 = vmatprep.subr.mxu0 %v385_v33  ;;  %597 = vmatprep.subr.mxu1 %v449_v34 }
 0x18b   :  { %527 = vmatpush2.msra.mxu0 %v384_v35  ;;  %598 = vmatpush2.msra.mxu1 %v448_v36 }
 0x18c   :  { %528 = vmatprep.subr.mxu0 %v383_v37  ;;  %599 = vmatprep.subr.mxu1 %v447_v38 }
 0x18d   :  { %529 = vmatpush2.msra.mxu0 %v382_v39  ;;  %600 = vmatpush2.msra.mxu1 %v446_v40 }
 0x18e   :  { %530 = vmatprep.subr.mxu0 %v381_v41  ;;  %601 = vmatprep.subr.mxu1 %v445_v42 }
 0x18f   :  { %531 = vmatpush2.msra.mxu0 %v380_v43  ;;  %602 = vmatpush2.msra.mxu1 %v444_v44 }
 0x190   :  { %532 = vmatprep.subr.mxu0 %v379_v45  ;;  %603 = vmatprep.subr.mxu1 %v443_v46 }
 0x191   :  { %533 = vmatpush2.msra.mxu0 %v378_v47  ;;  %604 = vmatpush2.msra.mxu1 %v442_v48 }
 0x192   :  { %534 = vmatprep.subr.mxu0 %v377_v49  ;;  %605 = vmatprep.subr.mxu1 %v441_v50 }
 0x193   :  { %535 = vmatpush2.msra.mxu0 %v376_v51  ;;  %606 = vmatpush2.msra.mxu1 %v440_v52 }
 0x194   :  { %536 = vmatprep.subr.mxu0 %v375_v53  ;;  %607 = vmatprep.subr.mxu1 %v439_v54 }
 0x195   :  { %537 = vmatpush2.msra.mxu0 %v374_v55  ;;  %608 = vmatpush2.msra.mxu1 %v438_v56 }
 0x196   :  { %538 = vmatprep.subr.mxu0 %v373_v57  ;;  %609 = vmatprep.subr.mxu1 %v437_v58 }
 0x197   :  { %539 = vmatpush2.msra.mxu0 %v372_v59  ;;  %610 = vmatpush2.msra.mxu1 %v436_v60 }
 0x198   :  { %540 = vmatprep.subr.mxu0 %v371_v61  ;;  %611 = vmatprep.subr.mxu1 %v435_v62 }
 0x199   :  { %541 = vmatpush2.msra.mxu0 %v370_v63  ;;  %612 = vmatpush2.msra.mxu1 %v434_v0 }
 0x21a   :  { %v258_v11 = vpop.f32.mrf.mxu0  ;;  %v329_v12 = vpop.f32.mrf.mxu1 }
 0x21b   :  { %v259_v13 = vadd.f32 %v258_v11, %v172_v6  ;;  %v330_v14 = vadd.f32 %v329_v12, %v180_v7 }
 0x21c   :  { %v260_v15 = vpop.f32.mrf.mxu0  ;;  %v331_v16 = vpop.f32.mrf.mxu1 }
 0x21d   :  { %v261_v17 = vadd.f32 %v260_v15, %v176_v9  ;;  %v332_v18 = vadd.f32 %v331_v16, %v184_v10  ;;  %v334_v21 = vmax.f32 %v259_v13, 0.0  ;;  %v336_v22 = vmax.f32 %v330_v14, 0.0 }
 0x21f   :  { %v335_v19 = vmax.f32 %v261_v17, 0.0  ;;  %v337_v20 = vmax.f32 %v332_v18, 0.0 }
 0x221   :  { %542 = vmatprep.mubr.f32.mxu0 %v335_v19  ;;  %613 = vmatprep.mubr.f32.mxu1 %v337_v20 }
 0x222   :  { %543 = vmatmul.mubr.f32.vlgmr.msra.gmra.mxu0 %v334_v21  ;;  %614 = vmatmul.mubr.f32.vlgmr.msra.gmra.mxu1 %v336_v22 }
 0x2e2   :  { %v544_v25 = vpop.f32.mrf.mxu0  ;;  %v615_v26 = vpop.f32.mrf.mxu1 }
 0x2e3   :  { %v545_v27 = vadd.f32 %v544_v25, %v471_v23 }
 0x2e4   :  { %v546_v28 = vpop.f32.mrf.mxu0  ;;  %v617_v31 = vpop.f32.mrf.mxu1 }
 0x2e5   :  { %v616_v29 = vadd.f32 %v615_v26, %v545_v27  ;;  %v547_v30 = vadd.f32 %v546_v28, %v475_v24 }
 0x2e7   :  { %v620_v32 = vmul.f32 %v616_v29, %v616_v29  ;;  %v618_v33 = vadd.f32 %v617_v31, %v547_v30 }
 0x2e9   :  { %v621_v34 = vmul.f32 %v618_v33, %v618_v33  ;;  %v623_v35 = vsel %vm622_vm5, %v620_v32, 0.0 }
 0x2eb   :  { %v624_v36 = vsel %vm622_vm5, %v621_v34, 0.0 }
 0x2ec   :  { %v625_v37 = vadd.f32 %v624_v36, %v623_v35 }
 0x2ee   :  { %626 = vadd.xlane.f32.xlu1 %v625_v37 }
 0x377   :  { %v627_v38 = vpop.xlane.xlu1 %626 }
 0x378   :  { %v628_v39 = vmax.f32 %v627_v38, 1e-24 }
 0x37a   :  { %685 = vrsqrt.f32 %v628_v39 }
 0x387   :  { %v686_v8 = vpop.eup %685 }
 0x388   :  { %v630_v5 = vmul.f32 %v686_v8, %v616_v29  ;;  %v631_v40 = vmul.f32 %v686_v8, %v618_v33 }
 0x38a   :  { %v634_v41 = vcombine.low %v630_v5, %v631_v40 }
 0x38c   :  { %663 = vst.sshfl [vmem:[#allocation12] sm:$0x33 pattern:$0x76325410] %v634_v41 }
 0x38d   :  { %778 = shalt.err (!%p775_p10)
}
 0x38e   :  { %653 = dma.vmem_to_hbm [thread:$0]  %s651_s22, 64, %s894_s6, [#allocation6]  }
 0x38f   :  { %793 = dma.done.wait [#allocation6], 64  }
 0x390   :  { %794 = vsyncadd [#allocation6], 4294967232 }
 0x391   :  { %657 = vsyncpa [#allocation5], 1 }
 0x392   :  { %658 = vsyncpa [#allocation8], 1 }
 0x393   :  { %659 = vsyncpa [#allocation11], 1 }
 0x394   :  { %660 = vsyncpa [#allocation6], 1 }

</bundles_post_ra>
